<compile_context>
chip_gen: v5e
topology: v5e:2x2
jax: 0.10.0
libtpu: 0.0.40
codegen_flags: <defaults>
</compile_context>

<pallas_src>
import functools

import jax
import jax.numpy as jnp
from jax.experimental import pallas as pl
from jax.experimental.pallas import tpu as pltpu

BN_EPS = 1e-5
LANES = 128
# Above the 16 MiB (v5e) / 32 MiB (v6e, v7x) default scoped limits, with
# headroom under v7x's 64 MiB physical VMEM.
_VMEM_LIMIT_BYTES = 40 * 1024 * 1024


def _round_up(n, m):
    return -(-n // m) * m


# --------------------------------------------------------------------------
# Fused single-shot kernel (whole batch resident; grid=()). Good for small /
# moderate batches where all activations fit comfortably in VMEM.
# --------------------------------------------------------------------------
def _actor_fused_kernel(x_ref, gamma_ref, beta_ref, w1_ref, w2_ref, b2_ref,
                        w3_ref, b3_ref, out_ref):
    mdt = w1_ref.dtype                       # weights already in matmul dtype
    B = x_ref.shape[0]
    inv_b = 1.0 / B                          # static python float

    # ---- fc1 (no bias: it cancels under training-mode BN) ----
    h1 = jnp.dot(x_ref[...].astype(mdt), w1_ref[...],
                 preferred_element_type=jnp.float32)

    # ---- BatchNorm1d batch stats via MXU ones-row reductions (f32 acc) ----
    ones = jnp.ones((1, B), jnp.float32)
    mean = jnp.dot(ones, h1, preferred_element_type=jnp.float32) * inv_b
    mean_sq = jnp.dot(ones, h1 * h1, preferred_element_type=jnp.float32) * inv_b
    var = jnp.maximum(mean_sq - mean * mean, 0.0)
    scale = jax.lax.rsqrt(var + BN_EPS) * gamma_ref[...]   # (1, F1)
    shift = beta_ref[...] - mean * scale                    # (1, F1)

    # ---- folded BN affine + ReLU in one pass over (B, F1) ----
    h1 = jnp.maximum(h1 * scale + shift, 0.0)

    # ---- fc2 + ReLU ----
    h2 = jnp.dot(h1.astype(mdt), w2_ref[...],
                 preferred_element_type=jnp.float32)
    h2 = jnp.maximum(h2 + b2_ref[...], 0.0)

    # ---- fc3 (lane-padded to 128) + tanh ----
    h3 = jnp.dot(h2.astype(mdt), w3_ref[...],
                 preferred_element_type=jnp.float32)
    out_ref[...] = jnp.tanh(h3 + b3_ref[...]).astype(out_ref.dtype)


# --------------------------------------------------------------------------
# Batch-tiled two-pass variant for large batches.
#   Pass A: per-tile fc1 + accumulate [sum; sum-of-squares] (axis 'arbitrary').
#   Pass B: recompute fc1 per tile, fold BN scale/shift in-kernel, fc2, fc3.
# --------------------------------------------------------------------------
def _actor_stats_kernel(x_ref, w1_ref, stats_ref):
    mdt = w1_ref.dtype
    tile_b = x_ref.shape[0]
    h1 = jnp.dot(x_ref[...].astype(mdt), w1_ref[...],
                 preferred_element_type=jnp.float32)

    # Column sums on the MXU (K = tile_b) instead of cross-sublane XLU sums.
    ones = jnp.ones((1, tile_b), jnp.float32)
    col_sum = jnp.dot(ones, h1, preferred_element_type=jnp.float32)
    col_sq = jnp.dot(ones, h1 * h1, preferred_element_type=jnp.float32)

    @pl.when(pl.program_id(0) == 0)
    def _():
        stats_ref[...] = jnp.zeros_like(stats_ref)

    stats_ref[0:1, :] += col_sum
    stats_ref[1:2, :] += col_sq


def _actor_apply_kernel(x_ref, stats_ref, gamma_ref, beta_ref, w1_ref, w2_ref,
                        b2_ref, w3_ref, b3_ref, out_ref, *, inv_b):
    mdt = w1_ref.dtype

    # Fold BN into one (1,F1) affine from the stacked sums (tiny VPU/EUP work).
    mean = stats_ref[0:1, :] * inv_b
    mean_sq = stats_ref[1:2, :] * inv_b
    var = jnp.maximum(mean_sq - mean * mean, 0.0)
    scale = jax.lax.rsqrt(var + BN_EPS) * gamma_ref[...]
    shift = beta_ref[...] - mean * scale

    h1 = jnp.dot(x_ref[...].astype(mdt), w1_ref[...],
                 preferred_element_type=jnp.float32)
    h1 = jnp.maximum(h1 * scale + shift, 0.0)
    h2 = jnp.dot(h1.astype(mdt), w2_ref[...],
                 preferred_element_type=jnp.float32)
    h2 = jnp.maximum(h2 + b2_ref[...], 0.0)
    h3 = jnp.dot(h2.astype(mdt), w3_ref[...],
                 preferred_element_type=jnp.float32)
    out_ref[...] = jnp.tanh(h3 + b3_ref[...]).astype(out_ref.dtype)


# --------------------------------------------------------------------------
# Wrappers
# --------------------------------------------------------------------------
@functools.partial(jax.jit, static_argnames=("action_size",))
def _forward_fused(x, gamma, beta, w1, w2, b2, w3p, b3p, *, action_size):
    B = x.shape[0]
    a_pad = w3p.shape[1]
    vmem = pl.BlockSpec(memory_space=pltpu.MemorySpace.VMEM)
    out = pl.pallas_call(
        _actor_fused_kernel,
        out_shape=jax.ShapeDtypeStruct((B, a_pad), jnp.float32),
        in_specs=[vmem] * 8,
        out_specs=vmem,
        compiler_params=pltpu.CompilerParams(
            vmem_limit_bytes=_VMEM_LIMIT_BYTES),
    )(x, gamma, beta, w1, w2, b2, w3p, b3p)
    return out[:, :action_size]


@functools.partial(
    jax.jit,
    static_argnames=("action_size", "tile_b", "core_parallel", "out_dtype"))
def _forward_tiled(x, gamma, beta, w1, w2, b2, w3p, b3p, *, action_size,
                   tile_b, core_parallel, out_dtype):
    B, S = x.shape
    F1 = w1.shape[1]
    F2 = w2.shape[1]
    a_pad = w3p.shape[1]

    # Ragged batch handling: pad to a tile multiple with zero rows. Because
    # fc1 has no bias in-kernel, padded rows contribute exactly 0 to the BN
    # sums; the statistics divide by the *real* batch size B.
    tile_b = min(int(tile_b), _round_up(B, 8))
    tile_b = _round_up(tile_b, 8)
    b_pad = _round_up(B, tile_b)
    if b_pad != B:
        x = jnp.pad(x, ((0, b_pad - B), (0, 0)))
    n_tiles = b_pad // tile_b
    inv_b = 1.0 / B

    # ---- Pass A: stacked BN batch statistics [sum; sum_sq], shape (2, F1) ----
    stats = pl.pallas_call(
        _actor_stats_kernel,
        out_shape=jax.ShapeDtypeStruct((2, F1), jnp.float32),
        grid=(n_tiles,),
        in_specs=[pl.BlockSpec((tile_b, S), lambda i: (i, 0)),
                  pl.BlockSpec((S, F1), lambda i: (0, 0))],
        out_specs=pl.BlockSpec((2, F1), lambda i: (0, 0)),
        compiler_params=pltpu.CompilerParams(
            dimension_semantics=("arbitrary",),
            vmem_limit_bytes=_VMEM_LIMIT_BYTES),
    )(x, w1)

    # ---- Pass B: normalize + fc2 + fc3; batch tiles are independent ----
    sem = pltpu.CORE_PARALLEL if core_parallel else "parallel"
    out = pl.pallas_call(
        functools.partial(_actor_apply_kernel, inv_b=inv_b),
        out_shape=jax.ShapeDtypeStruct((b_pad, a_pad), out_dtype),
        grid=(n_tiles,),
        in_specs=[pl.BlockSpec((tile_b, S), lambda i: (i, 0)),
                  pl.BlockSpec((2, F1), lambda i: (0, 0)),
                  pl.BlockSpec((1, F1), lambda i: (0, 0)),
                  pl.BlockSpec((1, F1), lambda i: (0, 0)),
                  pl.BlockSpec((S, F1), lambda i: (0, 0)),
                  pl.BlockSpec((F1, F2), lambda i: (0, 0)),
                  pl.BlockSpec((1, F2), lambda i: (0, 0)),
                  pl.BlockSpec((F2, a_pad), lambda i: (0, 0)),
                  pl.BlockSpec((1, a_pad), lambda i: (0, 0))],
        out_specs=pl.BlockSpec((tile_b, a_pad), lambda i: (i, 0)),
        compiler_params=pltpu.CompilerParams(
            dimension_semantics=(sem,),
            vmem_limit_bytes=_VMEM_LIMIT_BYTES),
    )(x, stats, gamma, beta, w1, w2, b2, w3p, b3p)
    return out[:B, :action_size].astype(jnp.float32)


def prepare_actor_params(params, use_bf16=False):
    """One-time prep (hoisted out of the forward): pad fc3 to 128 output
    lanes and pre-cast matmul operands to bf16 if requested. Biases / BN
    rows stay f32 (they are added to f32 accumulations)."""
    mdt = jnp.bfloat16 if use_bf16 else jnp.float32
    A = params["w3"].shape[1]
    a_pad = _round_up(max(A, LANES), LANES)
    w3p = jnp.pad(params["w3"], ((0, 0), (0, a_pad - A)))
    b3p = jnp.pad(params["b3"], ((0, 0), (0, a_pad - A)))
    return {
        "w1": params["w1"].astype(mdt),
        "w2": params["w2"].astype(mdt),
        "w3": w3p.astype(mdt),
        "b2": params["b2"],
        "b3": b3p,
        "gamma": params["gamma"],
        "beta": params["beta"],
        "action_size": A,
    }


def actor_forward(x, prepared, *, fused_max_batch=1024, tile_b=2048,
                  core_parallel=False, out_dtype=jnp.float32):
    """Dispatch: fused single-shot kernel for small batches, batch-tiled
    two-pass kernel for large ones. `core_parallel=True` targets v7x's second
    TensorCore on pass B; `out_dtype=jnp.bfloat16` halves pass-B writeback."""
    if x.ndim == 1:               # mirror the PyTorch unsqueeze(0)
        x = x[None, :]
    A = prepared["action_size"]
    args = (x, prepared["gamma"], prepared["beta"], prepared["w1"],
            prepared["w2"], prepared["b2"], prepared["w3"], prepared["b3"])
    if x.shape[0] <= fused_max_batch:
        return _forward_fused(*args, action_size=A)
    return _forward_tiled(*args, action_size=A, tile_b=tile_b,
                          core_parallel=core_parallel, out_dtype=out_dtype)


# --------------------------------------------------------------------------
# Parameter init mirroring the PyTorch module's reset_parameters().
# --------------------------------------------------------------------------
def init_actor_params(key, state_size, action_size, fc1_units=256,
                      fc2_units=128):
    """The reference _hidden_init uses weight.size()[0] == out_features, so
    hidden-layer limits are 1/sqrt(out_features); Linear biases follow the
    nn.Linear default U(-1/sqrt(in), 1/sqrt(in)). b1 is kept only for the
    reference path; it cancels exactly under training-mode BatchNorm."""
    ks = jax.random.split(key, 6)

    lim1 = 1.0 / jnp.sqrt(jnp.float32(fc1_units))
    lim2 = 1.0 / jnp.sqrt(jnp.float32(fc2_units))
    lim3 = 0.003

    blim1 = 1.0 / jnp.sqrt(jnp.float32(state_size))
    blim2 = 1.0 / jnp.sqrt(jnp.float32(fc1_units))
    blim3 = 1.0 / jnp.sqrt(jnp.float32(fc2_units))

    u = lambda k, shape, lim: jax.random.uniform(
        k, shape, jnp.float32, minval=-lim, maxval=lim)

    return {
        # weights stored as (in_features, out_features)
        "w1": u(ks[0], (state_size, fc1_units), lim1),
        "b1": u(ks[1], (1, fc1_units), blim1),
        "gamma": jnp.ones((1, fc1_units), jnp.float32),
        "beta": jnp.zeros((1, fc1_units), jnp.float32),
        "w2": u(ks[2], (fc1_units, fc2_units), lim2),
        "b2": u(ks[3], (1, fc2_units), blim2),
        "w3": u(ks[4], (fc2_units, action_size), lim3),
        "b3": u(ks[5], (1, action_size), blim3),
    }


def actor_reference(x, p):
    """Pure-JAX reference of the PyTorch forward (training-mode BN, incl. b1)."""
    h1 = x @ p["w1"] + p["b1"]
    mean = jnp.mean(h1, axis=0, keepdims=True)
    var = jnp.mean((h1 - mean) ** 2, axis=0, keepdims=True)
    h1 = (h1 - mean) * jax.lax.rsqrt(var + BN_EPS) * p["gamma"] + p["beta"]
    h1 = jnp.maximum(h1, 0.0)
    h2 = jnp.maximum(h1 @ p["w2"] + p["b2"], 0.0)
    return jnp.tanh(h2 @ p["w3"] + p["b3"])


if __name__ == "__main__":
    state_size = 16
    action_size = 4

    key = jax.random.PRNGKey(0)
    k_params, k_x = jax.random.split(key)
    params = init_actor_params(k_params, state_size, action_size)

    prep_f32 = prepare_actor_params(params, use_bf16=False)
    prep_bf16 = prepare_actor_params(params, use_bf16=True)

    # --- fused path (grid=()), small batch, f32 ---
    x = jax.random.normal(k_x, (8, state_size), jnp.float32)
    out = jax.block_until_ready(actor_forward(x, prep_f32))
    ref = actor_reference(x, params)
    assert out.shape == (8, action_size), out.shape
    err = float(jnp.max(jnp.abs(out - ref)))
    assert err < 5e-4, err

    # --- batch-tiled two-pass path, ragged batch (B=20, tile=8 -> 3 tiles) ---
    xt = jax.random.normal(jax.random.fold_in(k_x, 1), (20, state_size),
                           jnp.float32)
    out_t = jax.block_until_ready(
        actor_forward(xt, prep_f32, fused_max_batch=0, tile_b=8))
    ref_t = actor_reference(xt, params)
    assert out_t.shape == (20, action_size), out_t.shape
    err_t = float(jnp.max(jnp.abs(out_t - ref_t)))
    assert err_t < 5e-4, err_t

    # --- bf16 matmul-operand paths (v6e/v7x MXU), looser tolerance ---
    out_bf = jax.block_until_ready(actor_forward(x, prep_bf16))
    assert float(jnp.max(jnp.abs(out_bf - ref))) < 2e-2

    out_tbf = jax.block_until_ready(
        actor_forward(xt, prep_bf16, fused_max_batch=0, tile_b=8,
                      out_dtype=jnp.bfloat16))
    assert float(jnp.max(jnp.abs(out_tbf - ref_t))) < 3e-2

    print("KERNEL_OK")
</pallas_src>

<mosaic_0001>
module attributes {stable_mosaic.version = 11 : i64} {
  func.func @_actor_fused_kernel(%arg0: memref<8x16xf32, #tpu.memory_space<vmem>>, %arg1: memref<1x256xf32, #tpu.memory_space<vmem>>, %arg2: memref<1x256xf32, #tpu.memory_space<vmem>>, %arg3: memref<16x256xf32, #tpu.memory_space<vmem>>, %arg4: memref<256x128xf32, #tpu.memory_space<vmem>>, %arg5: memref<1x128xf32, #tpu.memory_space<vmem>>, %arg6: memref<128x128xf32, #tpu.memory_space<vmem>>, %arg7: memref<1x128xf32, #tpu.memory_space<vmem>>, %arg8: memref<8x128xf32, #tpu.memory_space<vmem>>) attributes {dimension_semantics = [], scalar_prefetch = 0 : i64, scratch_operands = 0 : i64, tpu.core_type = #tpu.core_type<tc>} {
    %c0 = arith.constant 0 : index
    %c0_0 = arith.constant 0 : index
    %0 = vector.load %arg0[%c0, %c0_0] : memref<8x16xf32, #tpu.memory_space<vmem>>, vector<8x16xf32>
    %c0_1 = arith.constant 0 : index
    %c0_2 = arith.constant 0 : index
    %1 = vector.load %arg3[%c0_1, %c0_2] : memref<16x256xf32, #tpu.memory_space<vmem>>, vector<16x256xf32>
    %cst = arith.constant dense<0.000000e+00> : vector<8x256xf32>
    %2 = tpu.matmul %0, %1, %cst {dimension_numbers = #tpu.dot_dimension_numbers<[1], [0], [0], [1], [0, 0, 1, 1], [], []>} : vector<8x16xf32>, vector<16x256xf32>, vector<8x256xf32> -> vector<8x256xf32>
    %cst_3 = arith.constant 1.000000e+00 : f32
    %3 = vector.broadcast %cst_3 : f32 to vector<1x8xf32>
    %cst_4 = arith.constant dense<0.000000e+00> : vector<1x256xf32>
    %4 = tpu.matmul %3, %2, %cst_4 {dimension_numbers = #tpu.dot_dimension_numbers<[1], [0], [0], [1], [0, 0, 1, 1], [], []>} : vector<1x8xf32>, vector<8x256xf32>, vector<1x256xf32> -> vector<1x256xf32>
    %cst_5 = arith.constant 1.250000e-01 : f32
    %5 = vector.broadcast %cst_5 : f32 to vector<1x256xf32>
    %6 = arith.mulf %4, %5 : vector<1x256xf32>
    %7 = arith.mulf %2, %2 : vector<8x256xf32>
    %cst_6 = arith.constant dense<0.000000e+00> : vector<1x256xf32>
    %8 = tpu.matmul %3, %7, %cst_6 {dimension_numbers = #tpu.dot_dimension_numbers<[1], [0], [0], [1], [0, 0, 1, 1], [], []>} : vector<1x8xf32>, vector<8x256xf32>, vector<1x256xf32> -> vector<1x256xf32>
    %cst_7 = arith.constant 1.250000e-01 : f32
    %9 = vector.broadcast %cst_7 : f32 to vector<1x256xf32>
    %10 = arith.mulf %8, %9 : vector<1x256xf32>
    %11 = arith.mulf %6, %6 : vector<1x256xf32>
    %12 = arith.subf %10, %11 : vector<1x256xf32>
    %cst_8 = arith.constant 0.000000e+00 : f32
    %13 = vector.broadcast %cst_8 : f32 to vector<1x256xf32>
    %14 = arith.maximumf %12, %13 : vector<1x256xf32>
    %cst_9 = arith.constant 9.99999974E-6 : f32
    %15 = vector.broadcast %cst_9 : f32 to vector<1x256xf32>
    %16 = arith.addf %14, %15 : vector<1x256xf32>
    %17 = math.rsqrt %16 : vector<1x256xf32>
    %c0_10 = arith.constant 0 : index
    %c0_11 = arith.constant 0 : index
    %18 = vector.load %arg1[%c0_10, %c0_11] : memref<1x256xf32, #tpu.memory_space<vmem>>, vector<1x256xf32>
    %19 = arith.mulf %17, %18 : vector<1x256xf32>
    %c0_12 = arith.constant 0 : index
    %c0_13 = arith.constant 0 : index
    %20 = vector.load %arg2[%c0_12, %c0_13] : memref<1x256xf32, #tpu.memory_space<vmem>>, vector<1x256xf32>
    %21 = arith.mulf %6, %19 : vector<1x256xf32>
    %22 = arith.subf %20, %21 : vector<1x256xf32>
    %23 = vector.broadcast %19 : vector<1x256xf32> to vector<8x256xf32>
    %24 = arith.mulf %2, %23 : vector<8x256xf32>
    %25 = vector.broadcast %22 : vector<1x256xf32> to vector<8x256xf32>
    %26 = arith.addf %24, %25 : vector<8x256xf32>
    %cst_14 = arith.constant 0.000000e+00 : f32
    %27 = vector.broadcast %cst_14 : f32 to vector<8x256xf32>
    %28 = arith.maximumf %26, %27 : vector<8x256xf32>
    %c0_15 = arith.constant 0 : index
    %c0_16 = arith.constant 0 : index
    %29 = vector.load %arg4[%c0_15, %c0_16] : memref<256x128xf32, #tpu.memory_space<vmem>>, vector<256x128xf32>
    %cst_17 = arith.constant dense<0.000000e+00> : vector<8x128xf32>
    %30 = tpu.matmul %28, %29, %cst_17 {dimension_numbers = #tpu.dot_dimension_numbers<[1], [0], [0], [1], [0, 0, 1, 1], [], []>} : vector<8x256xf32>, vector<256x128xf32>, vector<8x128xf32> -> vector<8x128xf32>
    %c0_18 = arith.constant 0 : index
    %c0_19 = arith.constant 0 : index
    %31 = vector.load %arg5[%c0_18, %c0_19] : memref<1x128xf32, #tpu.memory_space<vmem>>, vector<1x128xf32>
    %32 = vector.broadcast %31 : vector<1x128xf32> to vector<8x128xf32>
    %33 = arith.addf %30, %32 : vector<8x128xf32>
    %cst_20 = arith.constant 0.000000e+00 : f32
    %34 = vector.broadcast %cst_20 : f32 to vector<8x128xf32>
    %35 = arith.maximumf %33, %34 : vector<8x128xf32>
    %c0_21 = arith.constant 0 : index
    %c0_22 = arith.constant 0 : index
    %36 = vector.load %arg6[%c0_21, %c0_22] : memref<128x128xf32, #tpu.memory_space<vmem>>, vector<128x128xf32>
    %cst_23 = arith.constant dense<0.000000e+00> : vector<8x128xf32>
    %37 = tpu.matmul %35, %36, %cst_23 {dimension_numbers = #tpu.dot_dimension_numbers<[1], [0], [0], [1], [0, 0, 1, 1], [], []>} : vector<8x128xf32>, vector<128x128xf32>, vector<8x128xf32> -> vector<8x128xf32>
    %c0_24 = arith.constant 0 : index
    %c0_25 = arith.constant 0 : index
    %38 = vector.load %arg7[%c0_24, %c0_25] : memref<1x128xf32, #tpu.memory_space<vmem>>, vector<1x128xf32>
    %39 = vector.broadcast %38 : vector<1x128xf32> to vector<8x128xf32>
    %40 = arith.addf %37, %39 : vector<8x128xf32>
    %41 = math.tanh %40 : vector<8x128xf32>
    %c0_26 = arith.constant 0 : index
    %c0_27 = arith.constant 0 : index
    %42 = vector.load %arg8[%c0_26, %c0_27] : memref<8x128xf32, #tpu.memory_space<vmem>>, vector<8x128xf32>
    tpu.vector_store %arg8[%c0_26, %c0_27], %41 {strides = array<i32>} : memref<8x128xf32, #tpu.memory_space<vmem>>, vector<8x128xf32>,
    return
  }
}

</mosaic_0001>

<bundles_post_ra>
// kernel: _forward_fused.1
= control target key start
LH: loop header
LB: loop body
LE: loop exit
PB: predicated region body
PF: predicated region fallthrough
CT: control target
= control target key end

     0   :  { %13 = vsyncpa [#allocation3], 0  ;;  %s736_s0 = inlined_call_operand.hbm [shape: f32[8,16], index: 0, kind: input, shape index: {}]   ;;  %s737_s1 = inlined_call_operand.hbm [shape: f32[1,256], index: 1, kind: input, shape index: {}]   ;;  %s738_s2 = inlined_call_operand.hbm [shape: f32[1,256], index: 2, kind: input, shape index: {}]   ;;  %s739_s3 = inlined_call_operand.hbm [shape: f32[16,256], index: 3, kind: input, shape index: {}]   ;;  %s740_s4 = inlined_call_operand.hbm [shape: f32[256,128], index: 4, kind: input, shape index: {}]   ;;  %s741_s5 = inlined_call_operand.vmem [shape: f32[1,128], index: 5, kind: input, shape index: {}]   ;;  %s742_s6 = inlined_call_operand.hbm [shape: f32[128,128], index: 6, kind: input, shape index: {}]   ;;  %s743_s7 = inlined_call_operand.vmem [shape: f32[1,128], index: 7, kind: input, shape index: {}]   ;;  %s744_s8 = inlined_call_operand.vmem [shape: f32[8,128], index: 8, kind: output, shape index: {}]  }
   0x1   :  { %14 = vsyncpa [#allocation5], 0 }
   0x2   :  { %15 = vsyncpa [#allocation8], 0  ;;  %s33_s29 = sshll.u32 %s737_s1, 4  ;;  %s34_s29 = int_to_ptr.hbm [resolvable:$true] %s33_s29 }
   0x3   :  { %16 = vsyncpa [#allocation11], 0  ;;  %s619_s30 = smov [#allocation4]   ;;  %s54_s12 = sshll.u32 %s739_s3, 4  ;;  %s55_s12 = int_to_ptr.hbm [resolvable:$true] %s54_s12 }
   0x4   :  { %s35_s9 = sshll.u32 %s619_s30, 4  ;;  %s620_s13 = smov [#allocation7]   ;;  %s36_s9 = int_to_ptr.vmem [resolvable:$true] %s35_s9 }
   0x5   :  { %38 = dma.hbm_to_vmem [thread:$0]  %s34_s29, 32, %s36_s9, [#allocation5]  }
   0x6   :  { %s56_s14 = sshll.u32 %s620_s13, 4  ;;  %s621_s15 = smov 256   ;;  %s57_s14 = int_to_ptr.vmem [resolvable:$true] %s56_s14 }
   0x7   :  { %s622_s16 = smov 16   ;;  %s22_s1 = sshll.u32 %s736_s0, 4  ;;  %s23_s1 = int_to_ptr.hbm [resolvable:$true] %s22_s1 }
   0x8   :  { %62 = dma.hbm_to_vmem [thread:$0]  %s55_s12, 512, %s57_s14, [#allocation8], %s621_s15, %s621_s15, %s622_s16  }
   0x9   :  { %s623_s19 = smov [#allocation2]   ;;  %s44_s3 = sshll.u32 %s738_s2, 4  ;;  %s45_s3 = int_to_ptr.hbm [resolvable:$true] %s44_s3 }
   0xa   :  { %s24_s20 = sshll.u32 %s623_s19, 4  ;;  %s624_s23 = smov [#allocation6]   ;;  %s25_s20 = int_to_ptr.vmem [resolvable:$true] %s24_s20 }
   0xb   :  { %27 = dma.hbm_to_vmem [thread:$0]  %s23_s1, 128, %s25_s20, [#allocation3]  }
   0xc   :  { %s46_s24 = sshll.u32 %s624_s23, 4  ;;  %s67_s27 = sshll.u32 %s740_s4, 4  ;;  %s47_s24 = int_to_ptr.vmem [resolvable:$true] %s46_s24  ;;  %s68_s27 = int_to_ptr.hbm [resolvable:$true] %s67_s27 }
   0xd   :  { %49 = dma.hbm_to_vmem [thread:$0]  %s45_s3, 32, %s47_s24, [#allocation5]  }
   0xe   :  { %s625_s0 = smov [#allocation9]   ;;  %s82_s9 = sshll.u32 %s742_s6, 4  ;;  %s83_s9 = int_to_ptr.hbm [resolvable:$true] %s82_s9 }
   0xf   :  { %s69_s28 = sshll.u32 %s625_s0, 4  ;;  %s626_s10 = smov 128   ;;  %s70_s28 = int_to_ptr.vmem [resolvable:$true] %s69_s28 }
  0x10   :  { %s627_s2 = smov 8   ;;  %s628_s11 = smov [#allocation10]  }
  0x11   :  { %75 = dma.hbm_to_vmem [thread:$0]  %s68_s27, 4096, %s70_s28, [#allocation8], %s626_s10, %s626_s10, %s627_s2  }
  0x12   :  { %s84_s12 = sshll.u32 %s628_s11, 4  ;;  %s85_s12 = int_to_ptr.vmem [resolvable:$true] %s84_s12 }
  0x13   :  { %90 = dma.hbm_to_vmem [thread:$0]  %s83_s9, 2048, %s85_s12, [#allocation11], %s626_s10, %s626_s10, %s627_s2  }
  0x14   :  { %611 = dma.done.wait [#allocation3], 128  }
  0x15   :  { %612 = vsyncadd [#allocation3], 4294967168 }
  0x16   :  { %613 = dma.done.wait [#allocation5], 64  }
  0x17   :  { %614 = vsyncadd [#allocation5], 4294967232 }
  0x18   :  { %615 = dma.done.wait [#allocation8], 4608  }
  0x19   :  { %616 = vsyncadd [#allocation8], 4294962688 }
  0x1a   :  { %617 = dma.done.wait [#allocation11], 2048  }
  0x1b   :  { %618 = vsyncadd [#allocation11], 4294965248  ;;  %v120_v0 = vld [vmem:[#allocation7 + $0x10] sm:$0xff]  ;;  %v118_v1 = vld [vmem:[#allocation7] sm:$0xff]  ;;  %vm122_vm0 = vcmask 130048   ;;  %vm166_vm1 = vcmask 64512  }
  0x1c   :  { %v117_v2 = vld [vmem:[#allocation2] sm:$0xff]  ;;  %140 = vmatpush.msra.mxu3 %v120_v0  ;;  %v119_v4 = vld [vmem:[#allocation7 + $0x8] sm:$0xff]  ;;  %v629_v9 = vmov 1.0   ;;  %v327_v17 = vld [vmem:[#allocation9 + $0x60] sm:$0xff]  ;;  %vm298_vm8 = vcmask 1040384  }
  0x1d   :  { %v121_v3 = vld [vmem:[#allocation7 + $0x18] sm:$0xff]  ;;  %v329_v12 = vld [vmem:[#allocation9 + $0x70] sm:$0xff]  ;;  %v328_v14 = vld [vmem:[#allocation9 + $0x68] sm:$0xff] }
  0x1e   :  { %160 = vmatpush.msra.mxu1 %v121_v3  ;;  %141 = vmatpush.msra.mxu3 %v118_v1  ;;  %v330_v10 = vld [vmem:[#allocation9 + $0x78] sm:$0xff]  ;;  %v345_v13 = vld [vmem:[#allocation9 + $0xf0] sm:$0xff]  ;;  %v344_v15 = vld [vmem:[#allocation9 + $0xe8] sm:$0xff] }
  0x1f   :  { %442 = vmatmul.msk.f32.vlgmr.msra.gmra.mxu3 %vm122_vm0, %v117_v2  ;;  %v346_v11 = vld [vmem:[#allocation9 + $0xf8] sm:$0xff]  ;;  %351 = vmatpush.msra.mxu0 %v330_v10  ;;  %v343_v18 = vld [vmem:[#allocation9 + $0xe0] sm:$0xff]  ;;  %v325_v25 = vld [vmem:[#allocation9 + $0x50] sm:$0xff] }
  0x20   :  { %161 = vmatpush.msra.mxu1 %v119_v4  ;;  %v326_v21 = vld [vmem:[#allocation9 + $0x58] sm:$0xff]  ;;  %v341_v26 = vld [vmem:[#allocation9 + $0xd0] sm:$0xff]  ;;  %v324_v28 = vld [vmem:[#allocation9 + $0x48] sm:$0xff] }
  0x21   :  { %443 = vmatmul.msk.f32.vlgmr.msra.gmra.mxu1 %vm122_vm0, %v117_v2  ;;  %352 = vmatpush.msra.mxu0 %v329_v12  ;;  %v342_v22 = vld [vmem:[#allocation9 + $0xd8] sm:$0xff]  ;;  %v340_v29 = vld [vmem:[#allocation9 + $0xc8] sm:$0xff]  ;;  %v323_v32 = vld [vmem:[#allocation9 + $0x40] sm:$0xff] }
  0x22   :  { %371 = vmatpush.msrb.mxu1 %v346_v11  ;;  %v339_v33 = vld [vmem:[#allocation9 + $0xc0] sm:$0xff]  ;;  %v322_v35 = vld [vmem:[#allocation9 + $0x38] sm:$0xff]  ;;  %v321_v37 = vld [vmem:[#allocation9 + $0x30] sm:$0xff] }
  0x23   :  { %353 = vmatpush.msra.mxu0 %v328_v14  ;;  %v338_v36 = vld [vmem:[#allocation9 + $0xb8] sm:$0xff]  ;;  %v337_v38 = vld [vmem:[#allocation9 + $0xb0] sm:$0xff]  ;;  %v320_v39 = vld [vmem:[#allocation9 + $0x28] sm:$0xff] }
  0x24   :  { %372 = vmatpush.msrb.mxu1 %v345_v13  ;;  %v336_v40 = vld [vmem:[#allocation9 + $0xa8] sm:$0xff]  ;;  %v319_v42 = vld [vmem:[#allocation9 + $0x20] sm:$0xff]  ;;  %v318_v45 = vld [vmem:[#allocation9 + $0x18] sm:$0xff] }
  0x25   :  { %354 = vmatpush.msra.mxu0 %v327_v17  ;;  %v335_v43 = vld [vmem:[#allocation9 + $0xa0] sm:$0xff]  ;;  %v334_v46 = vld [vmem:[#allocation9 + $0x98] sm:$0xff]  ;;  %v317_v50 = vld [vmem:[#allocation9 + $0x10] sm:$0xff] }
  0x26   :  { %373 = vmatpush.msrb.mxu1 %v344_v15  ;;  %v333_v51 = vld [vmem:[#allocation9 + $0x90] sm:$0xff]  ;;  %v316_v54 = vld [vmem:[#allocation9 + $0x8] sm:$0xff]  ;;  %v315_v57 = vld [vmem:[#allocation9] sm:$0xff] }
  0x27   :  { %355 = vmatpush.msra.mxu0 %v326_v21  ;;  %v332_v55 = vld [vmem:[#allocation9 + $0x88] sm:$0xff]  ;;  %v331_v58 = vld [vmem:[#allocation9 + $0x80] sm:$0xff]  ;;  %v407_v61 = vld [vmem:[#allocation10 + $0x78] sm:$0xff] }
  0x28   :  { %374 = vmatpush.msrb.mxu1 %v343_v18  ;;  %v406_v62 = vld [vmem:[#allocation10 + $0x70] sm:$0xff]  ;;  %v405_v0 = vld [vmem:[#allocation10 + $0x68] sm:$0xff]  ;;  %v404_v1 = vld [vmem:[#allocation10 + $0x60] sm:$0xff] }
  0x29   :  { %356 = vmatpush.msra.mxu0 %v325_v25  ;;  %v284_v12 = vld [vmem:[#allocation4] sm:$0x3]  ;;  %v401_v13 = vld [vmem:[#allocation10 + $0x48] sm:$0xff]  ;;  %v400_v15 = vld [vmem:[#allocation10 + $0x40] sm:$0xff] }
  0x2a   :  { %375 = vmatpush.msrb.mxu1 %v342_v22  ;;  %v287_v17 = vperm.slane %v284_v12, 1  ;;  %v399_v21 = vld [vmem:[#allocation10 + $0x38] sm:$0xff] }
  0x2b   :  { %357 = vmatpush.msra.mxu0 %v324_v28  ;;  %v396_v28 = vld [vmem:[#allocation10 + $0x20] sm:$0xff] }
  0x2c   :  { %376 = vmatpush.msrb.mxu1 %v341_v26  ;;  %v397_v26 = vld [vmem:[#allocation10 + $0x28] sm:$0xff] }
  0x2d   :  { %358 = vmatpush.msra.mxu0 %v323_v32 }
  0x2e   :  { %377 = vmatpush.msrb.mxu1 %v340_v29  ;;  %v292_v29 = vld [vmem:[#allocation6] sm:$0x3] }
  0x2f   :  { %359 = vmatpush.msra.mxu0 %v322_v35 }
  0x30   :  { %378 = vmatpush.msrb.mxu1 %v339_v33 }
  0x31   :  { %360 = vmatpush.msra.mxu0 %v321_v37 }
  0x32   :  { %379 = vmatpush.msrb.mxu1 %v338_v36 }
  0x33   :  { %361 = vmatpush.msra.mxu0 %v320_v39 }
  0x34   :  { %380 = vmatpush.msrb.mxu1 %v337_v38 }
  0x35   :  { %362 = vmatpush.msra.mxu0 %v319_v42 }
  0x36   :  { %381 = vmatpush.msrb.mxu1 %v336_v40 }
  0x37   :  { %363 = vmatpush.msra.mxu0 %v318_v45  ;;  %v393_v45 = vld [vmem:[#allocation10 + $0x8] sm:$0xff] }
  0x38   :  { %382 = vmatpush.msrb.mxu1 %v335_v43 }
  0x39   :  { %364 = vmatpush.msra.mxu0 %v317_v50 }
  0x3a   :  { %383 = vmatpush.msrb.mxu1 %v334_v46  ;;  %v392_v46 = vld [vmem:[#allocation10] sm:$0xff] }
  0x3b   :  { %365 = vmatpush.msra.mxu0 %v316_v54 }
  0x3c   :  { %384 = vmatpush.msrb.mxu1 %v333_v51  ;;  %v460_v51 = vld [vmem:[%s743_s7] ss:$0 sm:$0xff] }
  0x3d   :  { %366 = vmatpush.msra.mxu0 %v315_v57 }
  0x3e   :  { %385 = vmatpush.msrb.mxu1 %v332_v55 }
  0x40   :  { %386 = vmatpush.msrb.mxu1 %v331_v58 }
  0x9e   :  { %v693_v5 = vpop.f32.mrf.mxu1 }
  0x9f   :  { %v213_v7 = vmul.f32 %v693_v5, %v693_v5 }
  0xa2   :  { %v695_v6 = vpop.f32.mrf.mxu3 }
  0xa3   :  { %185 = vmatpush.msrb.mxu3 %v695_v6  ;;  %v212_v8 = vmul.f32 %v695_v6, %v695_v6 }
  0xa4   :  { %444 = vmatmul.msk.f32.vlgmr.msrb.gmra.mxu3 %vm166_vm1, %v629_v9 }
  0xa5   :  { %229 = vmatpush.msra.mxu2 %v212_v8  ;;  %205 = vmatpush.msra.mxu3 %v693_v5 }
  0xa6   :  { %446 = vmatmul.msk.f32.vlgmr.msra.gmra.mxu2 %vm166_vm1, %v629_v9 }
  0xa7   :  { %249 = vmatpush.msrb.mxu3 %v213_v7  ;;  %412 = vmatpush.msrb.mxu2 %v407_v61  ;;  %v403_v7 = vld [vmem:[#allocation10 + $0x58] sm:$0xff] }
  0xa9   :  { %413 = vmatpush.msrb.mxu2 %v406_v62 }
  0xab   :  { %414 = vmatpush.msrb.mxu2 %v405_v0 }
  0xac   :  { %445 = vmatmul.msk.f32.vlgmr.msra.gmra.mxu3 %vm166_vm1, %v629_v9 }
  0xad   :  { %415 = vmatpush.msrb.mxu2 %v404_v1 }
  0xaf   :  { %416 = vmatpush.msrb.mxu2 %v403_v7 }
  0xb4   :  { %447 = vmatmul.msk.f32.vlgmr.msrb.gmra.mxu3 %vm166_vm1, %v629_v9  ;;  %v402_v9 = vld [vmem:[#allocation10 + $0x50] sm:$0xff] }
  0xb5   :  { %417 = vmatpush.msrb.mxu2 %v402_v9 }
  0xb7   :  { %418 = vmatpush.msrb.mxu2 %v401_v13 }
  0xb9   :  { %419 = vmatpush.msrb.mxu2 %v400_v15 }
  0xbb   :  { %420 = vmatpush.msrb.mxu2 %v399_v21 }
 0x127   :  { %v187_v16 = vpop.f32.mrf.mxu3 }
 0x128   :  { %v703_v19 = vmul.f32 0.125, %v187_v16  ;;  %v286_v16 = vperm.slane %v284_v12, 0 }
 0x129   :  { %v231_v20 = vpop.f32.mrf.mxu2 }
 0x12a   :  { %v256_v23 = vmul.f32 %v703_v19, %v703_v19  ;;  %v254_v24 = vmul.f32 0.125, %v231_v20 }
 0x12c   :  { %v258_v27 = vsub.f32 %v254_v24, %v256_v23  ;;  %v398_v23 = vld [vmem:[#allocation10 + $0x30] sm:$0xff] }
 0x12d   :  { %421 = vmatpush.msrb.mxu2 %v398_v23 }
 0x12e   :  { %v260_v30 = vmax.f32 %v258_v27, 0.0 }
 0x12f   :  { %v207_v31 = vpop.f32.mrf.mxu3  ;;  %422 = vmatpush.msrb.mxu2 %v397_v26 }
 0x130   :  { %v707_v34 = vadd.f32 1e-05, %v260_v30  ;;  %v710_v41 = vmul.f32 0.125, %v207_v31 }
 0x131   :  { %423 = vmatpush.msrb.mxu2 %v396_v28 }
 0x132   :  { %461 = vrsqrt.f32 %v707_v34  ;;  %v257_v48 = vmul.f32 %v710_v41, %v710_v41  ;;  %vm270_vm3 = vweird.f32 %v707_v34 }
 0x137   :  { %v251_v44 = vpop.f32.mrf.mxu3 }
 0x138   :  { %v712_v47 = vpop.eup %461  ;;  %v255_v49 = vmul.f32 0.125, %v251_v44  ;;  %v394_v44 = vld [vmem:[#allocation10 + $0x10] sm:$0xff] }
 0x139   :  { %v265_v53 = vmul.f32 %v712_v47, %v707_v34  ;;  %vm271_vm2 = vweird.f32 %v712_v47 }
 0x13a   :  { %v259_v52 = vsub.f32 %v255_v49, %v257_v48  ;;  %vm272_vm5 = vmor %vm270_vm3, %vm271_vm2 }
 0x13b   :  { %v266_v60 = vmul.f32 %v712_v47, %v265_v53 }
 0x13c   :  { %v261_v56 = vmax.f32 %v259_v52, 0.0 }
 0x13d   :  { %v267_v63 = vmul.f32 0.5, %v266_v60 }
 0x13e   :  { %v263_v59 = vadd.f32 1e-05, %v261_v56 }
 0x13f   :  { %v268_v3 = vsub.f32 1.5, %v267_v63 }
 0x140   :  { %463 = vrsqrt.f32 %v263_v59  ;;  %vm280_vm6 = vweird.f32 %v263_v59 }
 0x141   :  { %v269_v10 = vmul.f32 %v712_v47, %v268_v3 }
 0x143   :  { %v273_v20 = vsel %vm272_vm5, %v712_v47, %v269_v10 }
 0x144   :  { %v290_v24 = vmul.f32 %v286_v16, %v273_v20 }
 0x146   :  { %v464_v2 = vpop.eup %463  ;;  %v293_v30 = vmul.f32 %v290_v24, %v703_v19  ;;  %v302_v32 = vperm.slane %v290_v24, 0  ;;  %v395_v19 = vld [vmem:[#allocation10 + $0x18] sm:$0xff] }
 0x147   :  { %v275_v4 = vmul.f32 %v464_v2, %v263_v59  ;;  %vm281_vm4 = vweird.f32 %v464_v2  ;;  %424 = vmatpush.msrb.mxu2 %v395_v19 }
 0x148   :  { %vm282_vm7 = vmor %vm280_vm6, %vm281_vm4  ;;  %v304_v36 = vmul.f32 %v302_v32, %v695_v6  ;;  %v459_v6 = vld [vmem:[%s741_s5] ss:$0 sm:$0xff] }
 0x149   :  { %v276_v8 = vmul.f32 %v464_v2, %v275_v4  ;;  %425 = vmatpush.msrb.mxu2 %v394_v44 }
 0x14b   :  { %v277_v11 = vmul.f32 0.5, %v276_v8  ;;  %426 = vmatpush.msrb.mxu2 %v393_v45 }
 0x14d   :  { %v278_v14 = vsub.f32 1.5, %v277_v11  ;;  %427 = vmatpush.msrb.mxu2 %v392_v46 }
 0x14f   :  { %v279_v18 = vmul.f32 %v464_v2, %v278_v14 }
 0x151   :  { %v283_v22 = vsel %vm282_vm7, %v464_v2, %v279_v18 }
 0x152   :  { %v291_v25 = vmul.f32 %v287_v17, %v283_v22 }
 0x154   :  { %v294_v27 = vmul.f32 %v291_v25, %v710_v41  ;;  %v303_v33 = vperm.slane %v291_v25, 0 }
 0x156   :  { %v297_v31 = vrot.slane %v294_v27, 7  ;;  %v305_v38 = vmul.f32 %v303_v33, %v693_v5 }
 0x158   :  { %v299_v34 = vsel %vm298_vm8, %v293_v30, %v297_v31 }
 0x159   :  { %v301_v35 = vsub.f32 %v292_v29, %v299_v34 }
 0x15b   :  { %v307_v37 = vperm.slane %v301_v35, 0  ;;  %v308_v39 = vperm.slane %v301_v35, 1 }
 0x15d   :  { %v311_v40 = vadd.f32 %v307_v37, %v304_v36  ;;  %v312_v41 = vadd.f32 %v308_v39, %v305_v38 }
 0x15f   :  { %v313_v42 = vmax.f32 %v311_v40, 0.0  ;;  %v314_v43 = vmax.f32 %v312_v41, 0.0 }
 0x161   :  { %367 = vmatmul.f32.vlgmr.msra.gmra.mxu0 %v313_v42  ;;  %387 = vmatmul.f32.vlgmr.msrb.gmra.mxu1 %v314_v43 }
 0x1de   :  { %v368_v5 = vpop.f32.mrf.mxu0  ;;  %v388_v48 = vpop.f32.mrf.mxu1 }
 0x1df   :  { %v369_v47 = vadd.f32 %v459_v6, %v368_v5 }
 0x1e1   :  { %v389_v49 = vadd.f32 %v388_v48, %v369_v47 }
 0x1e3   :  { %v391_v50 = vmax.f32 %v389_v49, 0.0 }
 0x1e5   :  { %428 = vmatmul.f32.vlgmr.msrb.gmra.mxu2 %v391_v50 }
 0x268   :  { %v429_v52 = vpop.f32.mrf.mxu2 }
 0x269   :  { %v430_v53 = vadd.f32 %v460_v51, %v429_v52 }
 0x26b   :  { %465 = vtanh.f32 %v430_v53 }
 0x271   :  { %v466_v54 = vpop.eup %465 }
 0x272   :  { %433 = vst [vmem:[%s744_s8] sm:$0xff] %v466_v54 }
 0x273   :  { %438 = vsyncpa [#allocation3], 1 }
 0x274   :  { %439 = vsyncpa [#allocation5], 1 }
 0x275   :  { %440 = vsyncpa [#allocation8], 1 }
 0x276   :  { %441 = vsyncpa [#allocation11], 1 }

</bundles_post_ra>
